<compile_context>
chip_gen: v5e
topology: v5e:2x2
jax: 0.10.0
libtpu: 0.0.40
codegen_flags: <defaults>
</compile_context>

<pallas_src>
import functools

import jax
import jax.numpy as jnp
from jax import lax
from jax.experimental import pallas as pl
from jax.experimental.pallas import tpu as pltpu


def _rbf_tile_kernel_pow(xr_ref, xt_ref, rn_ref, cn_ref, c_ref, out_ref, *,
                         n_kernels, step_pow, use_bf16):
    """Integer mul_factor path: one exp + VPU power chain.

    c_ref[0] = -1 / (bandwidth * max_multiplier)  (negative scalar, SMEM).
    The k-th kernel term equals t ** (mul_factor ** (n_kernels-1-k)) with
    t = exp(c * l2).
    """
    c = c_ref[0]
    xr = xr_ref[...] * (-2.0 * c)          # fold the (-2c) into the row block, O(tm*d)
    xt = xt_ref[...]
    if use_bf16:
        xr = xr.astype(jnp.bfloat16)
        xt = xt.astype(jnp.bfloat16)
    gram_s = lax.dot_general(               # = (-2c) * (xi . xj)
        xr, xt,
        dimension_numbers=(((1,), (0,)), ((), ())),
        preferred_element_type=jnp.float32,
    )
    rn_s = rn_ref[...] * c                  # (tm, 1), O(tm)
    cn_s = cn_ref[...] * c                  # (1, tn), O(tn)
    # z = c * max(l2, 0)  (c < 0  =>  clamp with min(., 0))
    z = jnp.minimum(rn_s + cn_s + gram_s, 0.0)
    t = jnp.exp(z)                          # single EUP pass per element
    acc = t
    cur = t
    for _ in range(n_kernels - 1):          # cheap VPU multiplies
        cur = cur * cur if step_pow == 2 else lax.integer_pow(cur, step_pow)
        acc = acc + cur
    out_ref[...] = acc


def _rbf_tile_kernel_general(xr_ref, xt_ref, rn_ref, cn_ref, nid_ref, out_ref, *,
                             n_kernels, use_bf16):
    """Arbitrary multipliers: nid_ref[k] = -1/(bandwidth * mult_k) (SMEM scalars)."""
    xr = xr_ref[...]
    xt = xt_ref[...]
    if use_bf16:
        xr = xr.astype(jnp.bfloat16)
        xt = xt.astype(jnp.bfloat16)
    gram = lax.dot_general(
        xr, xt,
        dimension_numbers=(((1,), (0,)), ((), ())),
        preferred_element_type=jnp.float32,
    )
    l2 = jnp.maximum(rn_ref[...] + cn_ref[...] - 2.0 * gram, 0.0)
    acc = jnp.exp(l2 * nid_ref[0])
    for k in range(1, n_kernels):
        acc = acc + jnp.exp(l2 * nid_ref[k])
    out_ref[...] = acc


def _round_up(a, b):
    return (a + b - 1) // b * b


def _pick_tiles(n, d):
    """Lane-wide output tiles; >= 2 row tiles once N >= 128 (v7x megacore)."""
    if n < 128:
        return n, n                         # single full-array block
    tn = min(1024, max(128, (n // 128) * 128))
    if n >= 1024:
        tm = 512
    elif n >= 512:
        tm = 256
    elif n >= 256:
        tm = 128
    else:
        tm = 64
    # keep the per-step VMEM working set (double-buffered X blocks + ~6
    # tile-sized f32 buffers for out/temporaries) comfortably under ~40 MiB.
    def working_set(tm_, tn_):
        return 4 * d * (tm_ + tn_) * 2 + 4 * tm_ * tn_ * 6
    while tn > 256 and working_set(tm, tn) > 40 * 1024 * 1024:
        tn //= 2
    while tm > 128 and working_set(tm, tn) > 40 * 1024 * 1024:
        tm //= 2
    return tm, tn


def rbf_forward(x, *, n_kernels=5, mul_factor=2.0, bandwidth=None):
    """JAX/Pallas equivalent of RBF.forward(X).  x: (N, D) -> (N, N) float32."""
    x = jnp.asarray(x, jnp.float32)
    n, d = x.shape

    # Centre the data: pairwise distances are translation-invariant and both
    # the closed-form bandwidth and the Gram-trick distances become much
    # better conditioned in f32.
    x = x - jnp.mean(x, axis=0, keepdims=True)

    multipliers = (
        mul_factor ** (jnp.arange(n_kernels, dtype=jnp.float32) - n_kernels // 2)
    ).astype(jnp.float32)

    sq_norms = jnp.sum(x * x, axis=-1)                         # (N,)

    if bandwidth is None:
        # sum_ij ||xi - xj||^2 = 2N * sum ||xi||^2 - 2 ||sum_i xi||^2
        col_sum = jnp.sum(x, axis=0)
        total_l2 = 2.0 * n * jnp.sum(sq_norms) - 2.0 * jnp.sum(col_sum * col_sum)
        bw = total_l2 / jnp.float32(n * n - n)
    else:
        bw = jnp.float32(bandwidth)

    tm, tn = _pick_tiles(n, d)
    n_pad_row = _round_up(n, tm)
    n_pad_col = _round_up(n, tn)

    # Pad inputs only (cheap, O(N*D)); the output stays (N, N) with masked
    # boundary stores -> no N^2 slice afterwards.
    x_row = x if n_pad_row == n else jnp.zeros((n_pad_row, d), jnp.float32).at[:n].set(x)
    x_col_t = (x.T if n_pad_col == n
               else jnp.zeros((d, n_pad_col), jnp.float32).at[:, :n].set(x.T))
    sq_row = (sq_norms if n_pad_row == n
              else jnp.zeros((n_pad_row,), jnp.float32).at[:n].set(sq_norms))
    sq_col = (sq_norms if n_pad_col == n
              else jnp.zeros((n_pad_col,), jnp.float32).at[:n].set(sq_norms))
    row_norms = sq_row.reshape(n_pad_row, 1)
    col_norms = sq_col.reshape(1, n_pad_col)

    use_bf16 = d >= 256                      # keep the Gram dot off the MXU crit path
    mf = float(mul_factor)
    use_pow = (mf >= 1.0) and (mf == int(mf)) and n_kernels >= 1
    if use_pow:
        max_mult = mf ** (n_kernels - 1 - n_kernels // 2)
        scalars = (-1.0 / (bw * jnp.float32(max_mult))).reshape(1).astype(jnp.float32)
        n_transc = 1
        kernel = functools.partial(_rbf_tile_kernel_pow, n_kernels=n_kernels,
                                   step_pow=int(mf), use_bf16=use_bf16)
    else:
        scalars = (-1.0 / (bw * multipliers)).astype(jnp.float32)
        n_transc = n_kernels
        kernel = functools.partial(_rbf_tile_kernel_general, n_kernels=n_kernels,
                                   use_bf16=use_bf16)

    grid = (pl.cdiv(n, tm), pl.cdiv(n, tn))

    cost = pl.CostEstimate(
        flops=int(2 * n * n * d + 13 * n * n),
        transcendentals=int(n_transc * n * n),
        bytes_accessed=int(4 * (n * n + 2 * n * d + 2 * n)),
    )

    out = pl.pallas_call(
        kernel,
        out_shape=jax.ShapeDtypeStruct((n, n), jnp.float32),
        grid=grid,
        in_specs=[
            pl.BlockSpec((tm, d), lambda i, j: (i, 0)),          # row block of X
            pl.BlockSpec((d, tn), lambda i, j: (0, j)),          # col block of X^T (lane-dense)
            pl.BlockSpec((tm, 1), lambda i, j: (i, 0)),          # ||xi||^2 (row block)
            pl.BlockSpec((1, tn), lambda i, j: (0, j)),          # ||xj||^2 (col block)
            pl.BlockSpec(memory_space=pltpu.MemorySpace.SMEM),   # scalar exp coefficients
        ],
        out_specs=pl.BlockSpec((tm, tn), lambda i, j: (i, j)),
        compiler_params=pltpu.CompilerParams(
            dimension_semantics=("parallel", "parallel"),  # 2 TCs on v7x; no-op on v5e/v6e
            vmem_limit_bytes=48 * 1024 * 1024,             # > 16/32 MiB defaults, < v7x 64 MiB
        ),
        cost_estimate=cost,
    )(x_row, x_col_t, row_norms, col_norms, scalars)

    return out


def _rbf_reference(x, *, n_kernels=5, mul_factor=2.0, bandwidth=None):
    """Pure-JAX reference mirroring the PyTorch code (pairwise-difference cdist)."""
    x = jnp.asarray(x, jnp.float32)
    diffs = x[:, None, :] - x[None, :, :]
    l2 = jnp.sum(diffs * diffs, axis=-1)
    n = x.shape[0]
    bw = jnp.sum(l2) / (n * n - n) if bandwidth is None else jnp.float32(bandwidth)
    mults = (
        mul_factor ** (jnp.arange(n_kernels, dtype=jnp.float32) - n_kernels // 2)
    ).astype(jnp.float32)
    return jnp.sum(jnp.exp(-l2[None, ...] / (bw * mults)[:, None, None]), axis=0)


if __name__ == "__main__":
    key = jax.random.PRNGKey(0)

    # 1) Default module path (mul_factor=2.0 -> exp + squaring chain), 2x1 grid,
    #    lane-wide 128x256 tiles, N a tile multiple.
    N, D = 256, 32
    x = jax.random.normal(key, (N, D), dtype=jnp.float32)
    out = jax.block_until_ready(rbf_forward(x, n_kernels=5, mul_factor=2.0))
    ref = _rbf_reference(x, n_kernels=5, mul_factor=2.0)
    assert out.shape == (N, N)
    assert jnp.allclose(out, ref, atol=1e-3, rtol=1e-3), "pow2 path mismatch vs reference"

    # 2) Non-integer mul_factor fallback path, small single full-array tile.
    x2 = jax.random.normal(jax.random.PRNGKey(1), (40, 16), dtype=jnp.float32)
    out2 = jax.block_until_ready(rbf_forward(x2, n_kernels=3, mul_factor=1.5))
    ref2 = _rbf_reference(x2, n_kernels=3, mul_factor=1.5)
    assert out2.shape == (40, 40)
    assert jnp.allclose(out2, ref2, atol=1e-3, rtol=1e-3), "general path mismatch vs reference"

    # 3) Integer mul_factor != 2 power chain + non-tile-aligned N (exercises the
    #    masked boundary stores of the unpadded (N, N) output).
    x3 = jax.random.normal(jax.random.PRNGKey(2), (200, 32), dtype=jnp.float32)
    out3 = jax.block_until_ready(rbf_forward(x3, n_kernels=4, mul_factor=3.0))
    ref3 = _rbf_reference(x3, n_kernels=4, mul_factor=3.0)
    assert out3.shape == (200, 200)
    assert jnp.allclose(out3, ref3, atol=1e-3, rtol=1e-3), "int-pow / boundary path mismatch"

    # 4) Explicit-bandwidth path.
    out4 = jax.block_until_ready(rbf_forward(x2, n_kernels=5, mul_factor=2.0, bandwidth=1.7))
    ref4 = _rbf_reference(x2, n_kernels=5, mul_factor=2.0, bandwidth=1.7)
    assert jnp.allclose(out4, ref4, atol=1e-3, rtol=1e-3), "explicit bandwidth mismatch"

    print("KERNEL_OK")
</pallas_src>

<mosaic_0001>
module attributes {stable_mosaic.version = 11 : i64} {
  func.func @_rbf_tile_kernel_pow(%arg0: i32, %arg1: i32, %arg2: memref<128x32xf32, #tpu.memory_space<vmem>>, %arg3: memref<32x256xf32, #tpu.memory_space<vmem>>, %arg4: memref<128x1xf32, #tpu.memory_space<vmem>>, %arg5: memref<1x256xf32, #tpu.memory_space<vmem>>, %arg6: memref<1xf32, #tpu.memory_space<smem>>, %arg7: memref<128x256xf32, #tpu.memory_space<vmem>>) attributes {dimension_semantics = [#tpu.dimension_semantics<parallel>, #tpu.dimension_semantics<parallel>], iteration_bounds = array<i64: 2, 1>, scalar_prefetch = 0 : i64, scratch_operands = 0 : i64, tpu.core_type = #tpu.core_type<tc>, window_params = [{transform_indices = @transform_0, window_bounds = array<i64: 128, 32>}, {transform_indices = @transform_1, window_bounds = array<i64: 32, 256>}, {transform_indices = @transform_2, window_bounds = array<i64: 128, 1>}, {transform_indices = @transform_3, window_bounds = array<i64: 1, 256>}, {transform_indices = @transform_4, window_bounds = array<i64: 1>}, {transform_indices = @transform_5, window_bounds = array<i64: 128, 256>}]} {
    %c0 = arith.constant 0 : index
    %0 = memref.load %arg6[%c0] : memref<1xf32, #tpu.memory_space<smem>>
    %c0_0 = arith.constant 0 : index
    %c0_1 = arith.constant 0 : index
    %1 = vector.load %arg2[%c0_0, %c0_1] : memref<128x32xf32, #tpu.memory_space<vmem>>, vector<128x32xf32>
    %cst = arith.constant -2.000000e+00 : f32
    %2 = arith.mulf %cst, %0 : f32
    %3 = vector.broadcast %2 : f32 to vector<128x32xf32>
    %4 = arith.mulf %1, %3 : vector<128x32xf32>
    %c0_2 = arith.constant 0 : index
    %c0_3 = arith.constant 0 : index
    %5 = vector.load %arg3[%c0_2, %c0_3] : memref<32x256xf32, #tpu.memory_space<vmem>>, vector<32x256xf32>
    %cst_4 = arith.constant dense<0.000000e+00> : vector<128x256xf32>
    %6 = tpu.matmul %4, %5, %cst_4 {dimension_numbers = #tpu.dot_dimension_numbers<[1], [0], [0], [1], [0, 0, 1, 1], [], []>} : vector<128x32xf32>, vector<32x256xf32>, vector<128x256xf32> -> vector<128x256xf32>
    %c0_5 = arith.constant 0 : index
    %c0_6 = arith.constant 0 : index
    %7 = vector.load %arg4[%c0_5, %c0_6] : memref<128x1xf32, #tpu.memory_space<vmem>>, vector<128x1xf32>
    %8 = vector.broadcast %0 : f32 to vector<128x1xf32>
    %9 = arith.mulf %7, %8 : vector<128x1xf32>
    %c0_7 = arith.constant 0 : index
    %c0_8 = arith.constant 0 : index
    %10 = vector.load %arg5[%c0_7, %c0_8] : memref<1x256xf32, #tpu.memory_space<vmem>>, vector<1x256xf32>
    %11 = vector.broadcast %0 : f32 to vector<1x256xf32>
    %12 = arith.mulf %10, %11 : vector<1x256xf32>
    %13 = vector.broadcast %9 : vector<128x1xf32> to vector<128x256xf32>
    %14 = vector.broadcast %12 : vector<1x256xf32> to vector<128x256xf32>
    %15 = arith.addf %13, %14 : vector<128x256xf32>
    %16 = arith.addf %15, %6 : vector<128x256xf32>
    %cst_9 = arith.constant 0.000000e+00 : f32
    %17 = vector.broadcast %cst_9 : f32 to vector<128x256xf32>
    %18 = arith.minimumf %16, %17 : vector<128x256xf32>
    %19 = math.exp %18 : vector<128x256xf32>
    %20 = arith.mulf %19, %19 : vector<128x256xf32>
    %21 = arith.addf %19, %20 : vector<128x256xf32>
    %22 = arith.mulf %20, %20 : vector<128x256xf32>
    %23 = arith.addf %21, %22 : vector<128x256xf32>
    %24 = arith.mulf %22, %22 : vector<128x256xf32>
    %25 = arith.addf %23, %24 : vector<128x256xf32>
    %26 = arith.mulf %24, %24 : vector<128x256xf32>
    %27 = arith.addf %25, %26 : vector<128x256xf32>
    %c0_10 = arith.constant 0 : index
    %c0_11 = arith.constant 0 : index
    %28 = vector.load %arg7[%c0_10, %c0_11] : memref<128x256xf32, #tpu.memory_space<vmem>>, vector<128x256xf32>
    tpu.vector_store %arg7[%c0_10, %c0_11], %27 {strides = array<i32>} : memref<128x256xf32, #tpu.memory_space<vmem>>, vector<128x256xf32>,
    return
  }
  func.func @transform_0(%arg0: i32, %arg1: i32) -> (i32, i32) {
    %c0_i32 = arith.constant 0 : i32
    %c0_i32_0 = arith.constant 0 : i32
    return %arg0, %c0_i32 : i32, i32
  }
  func.func @transform_1(%arg0: i32, %arg1: i32) -> (i32, i32) {
    %c0_i32 = arith.constant 0 : i32
    %c0_i32_0 = arith.constant 0 : i32
    return %c0_i32, %arg1 : i32, i32
  }
  func.func @transform_2(%arg0: i32, %arg1: i32) -> (i32, i32) {
    %c0_i32 = arith.constant 0 : i32
    %c0_i32_0 = arith.constant 0 : i32
    return %arg0, %c0_i32 : i32, i32
  }
  func.func @transform_3(%arg0: i32, %arg1: i32) -> (i32, i32) {
    %c0_i32 = arith.constant 0 : i32
    %c0_i32_0 = arith.constant 0 : i32
    return %c0_i32, %arg1 : i32, i32
  }
  func.func @transform_4(%arg0: i32, %arg1: i32) -> i32 {
    %c0_i32 = arith.constant 0 : i32
    %c0_i32_0 = arith.constant 0 : i32
    return %c0_i32 : i32
  }
  func.func @transform_5(%arg0: i32, %arg1: i32) -> (i32, i32) {
    %c0_i32 = arith.constant 0 : i32
    return %arg0, %arg1 : i32, i32
  }
}

</mosaic_0001>

<bundles_post_ra>
// kernel: tpu_custom_call.1
= control target key start
LH: loop header
LB: loop body
LE: loop exit
PB: predicated region body
PF: predicated region fallthrough
CT: control target
= control target key end

     0   :  { %s1933_s0 = inlined_call_operand.vmem [shape: f32[256,32], index: 0, kind: input, shape index: {}]   ;;  %s1934_s1 = inlined_call_operand.vmem [shape: f32[32,256], index: 1, kind: input, shape index: {}]   ;;  %s1935_s2 = inlined_call_operand.vmem [shape: f32[256,1], index: 2, kind: input, shape index: {}]   ;;  %s1936_s3 = inlined_call_operand.vmem [shape: f32[1,256], index: 3, kind: input, shape index: {}]   ;;  %s1937_s4 = inlined_call_operand.<no memory space> [shape: f32[1], index: 4, kind: input, shape index: {}]   ;;  %s1938_s5 = inlined_call_operand.hbm [shape: f32[256,256], index: 5, kind: output, shape index: {}]  }
   0x1   :  { %10 = sst [smem:[#allocation2]] %s1937_s4 }
   0x2   :  { %11 = vsyncpa [#allocation4], 0 }
   0x3   :  { %13 = vsyncpa [#allocation4 + $0x1], 0  ;;  %s1527_s20 = smov 0   ;;  %s1529_s21 = smov 0  }
   0x4   :  { %s1531_s22 = smov 0   ;;  %s1533_s23 = smov 0  }
   0x5   :  { %s1535_s24 = smov 0   ;;  %s1537_s25 = smov 0  }
   0x6 LB: > { %s1226_s4 = sadd.s32 4294967295, %s1489_s25   ;;  %s1227_s26 = sadd.s32 4294967294, %s1489_s25   ;;  %s1489_s25 = sphi %s1537_s25, %s19_s25   ;;  %s1485_s24 = sphi %s1535_s24, %s1945_s24   ;;  %s1481_s23 = sphi %s1533_s23, %s1944_s23   ;;  %s1477_s22 = sphi %s1531_s22, %s1943_s22   ;;  %s1473_s21 = sphi %s1529_s21, %s1942_s21   ;;  %s1469_s20 = sphi %s1527_s20, %s1941_s20  }
   0x7   : > { %s31_s27 = sadd.s32 1, %s1485_s24  ;;  %s165_s28 = sadd.s32 1, %s1477_s22 }
   0x8   : > { %p33_p0 = scmp.ge.s32.totalorder %s31_s27, 2  ;;  %p175_p1 = scmp.ne.s32.totalorder %s1477_s22, %s1473_s21 }
   0x9   : > { %p176_p2 = scmp.eq.s32.totalorder %s1226_s4, 1  ;;  %p181_p3 = scmp.ne.s32.totalorder %s1473_s21, %s1469_s20 }
   0xa   : > { %s1947_s27 = smov (%p33_p0, %s31_s27), 0  ;;  %p182_p5 = scmp.eq.s32.totalorder %s1227_s26, 1 }
   0xb   : > { %p1567_p4 = por %p176_p2, %p175_p1  ;;  %s160_s30 = ssub.s32 %s1485_s24, %s1947_s27 }
   0xc   : > { %p1232_p6 = scmp.ge.s32.totalorder %s1489_s25, 1  ;;  %p163_p7 = scmp.eq.s32.totalorder %s160_s30, 0 }
   0xd   : > { %p1574_p8 = por %p182_p5, %p181_p3  ;;  %p238_p9 = scmp.lt.s32.totalorder %s1489_s25, 3 }
   0xe   : > { %s1580_s7 = scalar_select %p163_p7, %s1477_s22, %s165_s28  }
   0xf   : > { %p239_p10 = pnand %p1232_p6, %p238_p9 }
  0x10   : > { %s1234_s14 = sshll.u32 (!%p239_p10), %s1481_s23, 4  ;;  %s1595_s17 = sld [smem:[#allocation2]] (!%p239_p10) }
  0x11   : > { %242 = sbr.rel (%p239_p10) target bundleno = 277 (0x115), region = 40  ;;  %p281_p11 = scmp.lt.s32.totalorder (!%p239_p10), %s1234_s14, 31 }
  0x12   : > { %s277_s4 = sand.u32 (!%p239_p10), 1, %s1473_s21   ;;  %s1277_s30 = sshll.u32 (!%p239_p10), %s1481_s23, 8 }
  0x13   : > { %s1233_s26 = sshll.u32 (!%p239_p10), %s277_s4, 8  ;;  %s1110_s23 = scalar_lea.hbm (!%p239_p10), %s1938_s5, %s1277_s30 }
  0x14   : > { %s1795_s28 = scalar_lea.vmem (!%p239_p10), [#allocation3], %s1233_s26  ;;  %s1113_s11 = sshll.u32 (!%p239_p10), %s1110_s23, 4  ;;  %s1114_s11 = int_to_ptr.hbm [resolvable:$true] %s1113_s11 }
  0x15   : > { %s1096_s12 = scalar_lea.sflag (!%p239_p10), [#allocation4], %s277_s4 }
  0x16   : > { %v346_v0 = vld [vmem:[%s1934_s1 + $0x30] sm:$0xff]  ;;  %v347_v1 = vld [vmem:[%s1934_s1 + $0x38] sm:$0xff]  ;;  %v344_v2 = vld [vmem:[%s1934_s1 + $0x20] sm:$0xff]  ;;  %s1949_s14 = smov (!%p281_p11, %s1234_s14), 31  ;;  %v1491_v8 = vmov 0   ;;  %v1621_v10 = vstv %s1595_s17  ;;  %vm348_vm0 = vcmask 261120  }
  0x17   : > { %409 = vmatpush.msra.mxu0 %v346_v0  ;;  %1278 = vmatpush.msra.mxu2 %v346_v0  ;;  %v345_v3 = vld [vmem:[%s1934_s1 + $0x28] sm:$0xff]  ;;  %v342_v4 = vld [vmem:[%s1934_s1 + $0x10] sm:$0xff]  ;;  %v343_v5 = vld [vmem:[%s1934_s1 + $0x18] sm:$0xff]  ;;  %s1235_s10 = sshll.u32 %s1949_s14, 3  ;;  %s322_s14 = smul.f32 -2.0, %s1595_s17 }
  0x18   : > { %474 = vmatpush.msra.mxu1 %v347_v1  ;;  %1282 = vmatpush.msra.mxu3 %v347_v1  ;;  %v340_v6 = vld [vmem:[%s1934_s1] sm:$0xff]  ;;  %v341_v7 = vld [vmem:[%s1934_s1 + $0x8] sm:$0xff]  ;;  %s1612_s13 = scalar_lea.vmem %s1935_s2, %s1235_s10  ;;  %s1617_s18 = scalar_lea.vmem %s1933_s0, %s1235_s10 }
  0x19   : > { %410 = vmatpush.msra.mxu0 %v344_v2  ;;  %1279 = vmatpush.msra.mxu2 %v344_v2  ;;  %v527_v9 = vld [vmem:[%s1612_s13] sm:$0xff]  ;;  %v529_v14 = vld [vmem:[%s1612_s13 + $0x10] sm:$0xff]  ;;  %v1628_v15 = vstv %s322_s14  ;;  %v528_v20 = vld [vmem:[%s1612_s13 + $0x8] sm:$0xff]  ;;  %s1111_s10 = sshll.u32 %s1795_s28, 4  ;;  %s1431_s14 = scalar_lea.hbm %s1938_s5, 512  ;;  %s1112_s10 = int_to_ptr.vmem [resolvable:$true] %s1111_s10 }
  0x1a   : > { %475 = vmatpush.msra.mxu1 %v345_v3  ;;  %1283 = vmatpush.msra.mxu3 %v345_v3  ;;  %v306_v11 = vld [vmem:[%s1617_s18] sm:$0xff]  ;;  %v544_v13 = vmul.f32 %v1621_v10, %v527_v9  ;;  %v546_v16 = vmul.f32 %v1621_v10, %v529_v14  ;;  %v530_v21 = vld [vmem:[%s1612_s13 + $0x18] sm:$0xff]  ;;  %v307_v23 = vld [vmem:[%s1617_s18 + $0x8] sm:$0xff]  ;;  %v545_v25 = vmul.f32 %v1621_v10, %v528_v20 }
  0x1b   : > { %411 = vmatpush.msra.mxu0 %v342_v4  ;;  %1280 = vmatpush.msra.mxu2 %v342_v4  ;;  %v314_v12 = vld [vmem:[%s1617_s18 + $0x40] sm:$0xff]  ;;  %v324_v17 = vmul.f32 %v1628_v15, %v306_v11  ;;  %v315_v24 = vld [vmem:[%s1617_s18 + $0x48] sm:$0xff]  ;;  %v547_v26 = vmul.f32 %v1621_v10, %v530_v21  ;;  %v325_v27 = vmul.f32 %v1628_v15, %v307_v23  ;;  %v533_v30 = vld [vmem:[%s1612_s13 + $0x30] sm:$0xff] }
  0x1c   : > { %476 = vmatpush.msra.mxu1 %v343_v5  ;;  %1284 = vmatpush.msra.mxu3 %v343_v5  ;;  %v332_v18 = vmul.f32 %v1628_v15, %v314_v12  ;;  %v531_v19 = vld [vmem:[%s1612_s13 + $0x20] sm:$0xff]  ;;  %v333_v28 = vmul.f32 %v1628_v15, %v315_v24  ;;  %v532_v29 = vld [vmem:[%s1612_s13 + $0x28] sm:$0xff]  ;;  %v534_v32 = vld [vmem:[%s1612_s13 + $0x38] sm:$0xff]  ;;  %v550_v35 = vmul.f32 %v1621_v10, %v533_v30 }
  0x1d   : > { %1344 = vset.pattern.permute.xlu0 %v1491_v8  ;;  %412 = vmatpush.msra.mxu0 %v340_v6  ;;  %v548_v22 = vmul.f32 %v1621_v10, %v531_v19  ;;  %v549_v31 = vmul.f32 %v1621_v10, %v532_v29  ;;  %v308_v33 = vld [vmem:[%s1617_s18 + $0x10] sm:$0xff]  ;;  %v551_v36 = vmul.f32 %v1621_v10, %v534_v32  ;;  %v535_v39 = vld [vmem:[%s1612_s13 + $0x40] sm:$0xff]  ;;  %v536_v40 = vld [vmem:[%s1612_s13 + $0x48] sm:$0xff] }
  0x1e   : > { %1281 = vmatpush.msra.mxu2 %v340_v6  ;;  %477 = vmatpush.msra.mxu1 %v341_v7  ;;  %v316_v34 = vld [vmem:[%s1617_s18 + $0x50] sm:$0xff]  ;;  %v326_v37 = vmul.f32 %v1628_v15, %v308_v33  ;;  %v552_v41 = vmul.f32 %v1621_v10, %v535_v39  ;;  %v309_v43 = vld [vmem:[%s1617_s18 + $0x18] sm:$0xff]  ;;  %v553_v45 = vmul.f32 %v1621_v10, %v536_v40  ;;  %v539_v50 = vld [vmem:[%s1612_s13 + $0x60] sm:$0xff] }
  0x1f   : > { %1285 = vmatpush.msra.mxu3 %v341_v7  ;;  %1345 = vset.pattern.permute.xlu1 %v1491_v8  ;;  %v334_v38 = vmul.f32 %v1628_v15, %v316_v34  ;;  %v537_v42 = vld [vmem:[%s1612_s13 + $0x50] sm:$0xff]  ;;  %v317_v44 = vld [vmem:[%s1617_s18 + $0x58] sm:$0xff]  ;;  %v327_v47 = vmul.f32 %v1628_v15, %v309_v43  ;;  %v540_v52 = vld [vmem:[%s1612_s13 + $0x68] sm:$0xff]  ;;  %v556_v55 = vmul.f32 %v1621_v10, %v539_v50 }
  0x20   : > { %564 = vperm.xlu0 %1344, %v544_v13   ;;  %574 = vperm.xlu1 %1345, %v546_v16   ;;  %v554_v46 = vmul.f32 %v1621_v10, %v537_v42  ;;  %v335_v48 = vmul.f32 %v1628_v15, %v317_v44  ;;  %v538_v49 = vld [vmem:[%s1612_s13 + $0x58] sm:$0xff]  ;;  %v310_v53 = vld [vmem:[%s1617_s18 + $0x20] sm:$0xff]  ;;  %v557_v56 = vmul.f32 %v1621_v10, %v540_v52  ;;  %v541_v59 = vld [vmem:[%s1612_s13 + $0x70] sm:$0xff] }
  0x21   : > { %1238 = vmatmul.msk.f32.vlgmr.msra.gmra.mxu0 %vm348_vm0, %v324_v17  ;;  %1246 = vmatmul.msk.f32.vlgmr.msra.gmra.mxu2 %vm348_vm0, %v332_v18  ;;  %v555_v51 = vmul.f32 %v1621_v10, %v538_v49  ;;  %v318_v54 = vld [vmem:[%s1617_s18 + $0x60] sm:$0xff]  ;;  %v328_v57 = vmul.f32 %v1628_v15, %v310_v53  ;;  %v542_v60 = vld [vmem:[%s1612_s13 + $0x78] sm:$0xff]  ;;  %v558_v61 = vmul.f32 %v1621_v10, %v541_v59  ;;  %v311_v62 = vld [vmem:[%s1617_s18 + $0x28] sm:$0xff]  ;;  %s1425_s13 = sshra.s32 %s1114_s11, 4  ;;  %s1426_s13 = int_to_ptr.hbm [resolvable:$true] %s1425_s13 }
  0x22   : > { %1254 = vmatmul.msk.f32.vlgmr.msra.gmra.mxu1 %vm348_vm0, %v324_v17  ;;  %1262 = vmatmul.msk.f32.vlgmr.msra.gmra.mxu3 %vm348_vm0, %v332_v18  ;;  %v336_v58 = vmul.f32 %v1628_v15, %v318_v54  ;;  %v319_v63 = vld [vmem:[%s1617_s18 + $0x68] sm:$0xff]  ;;  %v559_v0 = vmul.f32 %v1621_v10, %v542_v60  ;;  %v329_v1 = vmul.f32 %v1628_v15, %v311_v62  ;;  %v312_v3 = vld [vmem:[%s1617_s18 + $0x30] sm:$0xff]  ;;  %v313_v7 = vld [vmem:[%s1617_s18 + $0x38] sm:$0xff]  ;;  %s1427_s15 = scalar_lea.hbm %s1426_s13, 256  ;;  %p1432_p1 = scmp.lt.s32.totalorder %s1426_s13, %s1938_s5 }
  0x23   : > { %1346 = vset.pattern.permute.xlu2 %v1491_v8  ;;  %v337_v2 = vmul.f32 %v1628_v15, %v319_v63  ;;  %v320_v4 = vld [vmem:[%s1617_s18 + $0x70] sm:$0xff]  ;;  %v330_v5 = vmul.f32 %v1628_v15, %v312_v3  ;;  %v321_v8 = vld [vmem:[%s1617_s18 + $0x78] sm:$0xff]  ;;  %v331_v9 = vmul.f32 %v1628_v15, %v313_v7  ;;  %v560_v14 = vld [vmem:[%s1936_s3] sm:$0x3]  ;;  %p1428_p12 = scmp.ne.s32.totalorder %s1426_s13, %s1427_s15  ;;  %p1433_p2 = scmp.lt.s32.totalorder %s1431_s14, %s1427_s15 }
  0x24   : > { %584 = vperm.xlu2 %1346, %v548_v22   ;;  %v338_v6 = vmul.f32 %v1628_v15, %v320_v4  ;;  %v339_v11 = vmul.f32 %v1628_v15, %v321_v8  ;;  %v561_v18 = vmul.f32 %v560_v14, %v1621_v10 }
  0x25   : > { %p1429_p13 = pnand %p1428_p12, %p1567_p4  ;;  %p1434_p3 = por %p1433_p2, %p1432_p1 }
  0x26   : > { %v1725_v15 = vperm.slane %v561_v18, 0  ;;  %v1727_v20 = vperm.slane %v561_v18, 1 }
  0x27   : > { %p1430_p0 = pneg %p1429_p13 }
  0x28   : > { %569 = vperm.xlu0 %1344, %v545_v25   ;;  %579 = vperm.xlu1 %1345, %v547_v26  }
  0x29   : > { %1239 = vmatmul.msk.f32.gmra.mxu0 %vm348_vm0, %v325_v27  ;;  %1247 = vmatmul.msk.f32.gmra.mxu2 %vm348_vm0, %v333_v28  ;;  %p1435_p5 = pnand %p1434_p3, %p1430_p0 }
  0x2a   : > { %1255 = vmatmul.msk.f32.gmra.mxu1 %vm348_vm0, %v325_v27  ;;  %1263 = vmatmul.msk.f32.gmra.mxu3 %vm348_vm0, %v333_v28 }
  0x2c   : > { %589 = vperm.xlu2 %1346, %v549_v31  }
  0x30   : > { %594 = vperm.xlu0 %1344, %v550_v35   ;;  %599 = vperm.xlu1 %1345, %v551_v36  }
  0x31   : > { %1240 = vmatmul.msk.f32.gmra.mxu0 %vm348_vm0, %v326_v37  ;;  %1248 = vmatmul.msk.f32.gmra.mxu2 %vm348_vm0, %v334_v38 }
  0x32   : > { %1256 = vmatmul.msk.f32.gmra.mxu1 %vm348_vm0, %v326_v37  ;;  %1264 = vmatmul.msk.f32.gmra.mxu3 %vm348_vm0, %v334_v38 }
  0x34   : > { %604 = vperm.xlu2 %1346, %v552_v41  }
  0x38   : > { %609 = vperm.xlu0 %1344, %v553_v45   ;;  %614 = vperm.xlu1 %1345, %v554_v46  }
  0x39   : > { %1241 = vmatmul.msk.f32.gmra.mxu0 %vm348_vm0, %v327_v47  ;;  %1249 = vmatmul.msk.f32.gmra.mxu2 %vm348_vm0, %v335_v48 }
  0x3a   : > { %1257 = vmatmul.msk.f32.gmra.mxu1 %vm348_vm0, %v327_v47  ;;  %1265 = vmatmul.msk.f32.gmra.mxu3 %vm348_vm0, %v335_v48 }
  0x3c   : > { %619 = vperm.xlu2 %1346, %v555_v51  }
  0x40   : > { %624 = vperm.xlu0 %1344, %v556_v55   ;;  %629 = vperm.xlu1 %1345, %v557_v56  }
  0x41   : > { %1242 = vmatmul.msk.f32.gmra.mxu0 %vm348_vm0, %v328_v57  ;;  %1250 = vmatmul.msk.f32.gmra.mxu2 %vm348_vm0, %v336_v58 }
  0x42   : > { %1258 = vmatmul.msk.f32.gmra.mxu1 %vm348_vm0, %v328_v57  ;;  %1266 = vmatmul.msk.f32.gmra.mxu3 %vm348_vm0, %v336_v58 }
  0x44   : > { %634 = vperm.xlu2 %1346, %v558_v61  }
  0x48   : > { %639 = vperm.xlu0 %1344, %v559_v0  }
  0x49   : > { %1243 = vmatmul.msk.f32.gmra.mxu0 %vm348_vm0, %v329_v1  ;;  %1251 = vmatmul.msk.f32.gmra.mxu2 %vm348_vm0, %v337_v2 }
  0x4a   : > { %1259 = vmatmul.msk.f32.gmra.mxu1 %vm348_vm0, %v329_v1  ;;  %1267 = vmatmul.msk.f32.gmra.mxu3 %vm348_vm0, %v337_v2 }
  0x51   : > { %1244 = vmatmul.msk.f32.gmra.mxu0 %vm348_vm0, %v330_v5  ;;  %1252 = vmatmul.msk.f32.gmra.mxu2 %vm348_vm0, %v338_v6 }
  0x52   : > { %1260 = vmatmul.msk.f32.gmra.mxu1 %vm348_vm0, %v330_v5  ;;  %1268 = vmatmul.msk.f32.gmra.mxu3 %vm348_vm0, %v338_v6 }
  0x59   : > { %1245 = vmatmul.msk.f32.gmra.mxu0 %vm348_vm0, %v331_v9  ;;  %1253 = vmatmul.msk.f32.gmra.mxu2 %vm348_vm0, %v339_v11 }
  0x5a   : > { %1261 = vmatmul.msk.f32.gmra.mxu1 %vm348_vm0, %v331_v9  ;;  %1269 = vmatmul.msk.f32.gmra.mxu3 %vm348_vm0, %v339_v11 }
  0x7e   : > { %v585_v12 = vpop.permute.xlu2 %584 }
  0x7f   : > { %v1734_v35 = vadd.f32 %v1725_v15, %v585_v12  ;;  %v1737_v36 = vadd.f32 %v1727_v20, %v585_v12 }
  0x86   : > { %v590_v13 = vpop.permute.xlu2 %589 }
  0x87   : > { %v1741_v39 = vadd.f32 %v1725_v15, %v590_v13  ;;  %v1744_v40 = vadd.f32 %v1727_v20, %v590_v13 }
  0x8e   : > { %v605_v19 = vpop.permute.xlu2 %604 }
  0x8f   : > { %v663_v31 = vadd.f32 %v1725_v15, %v605_v19  ;;  %v664_v33 = vadd.f32 %v1727_v20, %v605_v19 }
  0x92   : > { %v565_v16 = vpop.permute.xlu0 %564  ;;  %v575_v17 = vpop.permute.xlu1 %574 }
  0x93   : > { %v647_v23 = vadd.f32 %v1725_v15, %v565_v16  ;;  %v648_v24 = vadd.f32 %v1727_v20, %v565_v16  ;;  %v651_v44 = vadd.f32 %v1725_v15, %v575_v17  ;;  %v652_v45 = vadd.f32 %v1727_v20, %v575_v17 }
  0x96   : > { %v620_v26 = vpop.permute.xlu2 %619 }
  0x97   : > { %v1768_v1 = vadd.f32 %v1725_v15, %v620_v26  ;;  %v1771_v2 = vadd.f32 %v1727_v20, %v620_v26 }
  0x9a   : > { %v570_v21 = vpop.permute.xlu0 %569  ;;  %v580_v22 = vpop.permute.xlu1 %579 }
  0x9b   : > { %v649_v37 = vadd.f32 %v1725_v15, %v570_v21  ;;  %v650_v41 = vadd.f32 %v1727_v20, %v570_v21  ;;  %v1750_v48 = vadd.f32 %v1725_v15, %v580_v22  ;;  %v1753_v49 = vadd.f32 %v1727_v20, %v580_v22 }
  0x9e   : > { %v414_v25 = vpop.f32.mrf.mxu0  ;;  %v635_v61 = vpop.permute.xlu2 %634 }
  0x9f   : > { %v679_v27 = vadd.f32 %v647_v23, %v414_v25  ;;  %v479_v28 = vpop.f32.mrf.mxu1  ;;  %v1776_v11 = vadd.f32 %v1725_v15, %v635_v61  ;;  %v1779_v12 = vadd.f32 %v1727_v20, %v635_v61 }
  0xa0   : > { %v680_v29 = vadd.f32 %v648_v24, %v479_v28 }
  0xa1   : > { %v711_v30 = vmin.f32 %v679_v27, 0.0 }
  0xa2   : > { %v595_v10 = vpop.permute.xlu0 %594  ;;  %v712_v32 = vmin.f32 %v680_v29, 0.0  ;;  %v600_v34 = vpop.permute.xlu1 %599 }
  0xa3   : > { %v743_v38 = vmul.f32 1.442695, %v711_v30  ;;  %v1756_v52 = vadd.f32 %v1725_v15, %v595_v10  ;;  %v1759_v53 = vadd.f32 %v1727_v20, %v595_v10  ;;  %v1762_v59 = vadd.f32 %v1725_v15, %v600_v34 }
  0xa4   : > { %v745_v42 = vmul.f32 1.442695, %v712_v32  ;;  %v438_v43 = vpop.f32.mrf.mxu2  ;;  %v1765_v60 = vadd.f32 %v1727_v20, %v600_v34 }
  0xa5   : > { %1347 = vpow2.f32 %v743_v38  ;;  %v695_v46 = vadd.f32 %v663_v31, %v438_v43  ;;  %v503_v47 = vpop.f32.mrf.mxu3 }
  0xa6   : > { %1349 = vpow2.f32 %v745_v42  ;;  %v696_v50 = vadd.f32 %v664_v33, %v503_v47  ;;  %v417_v51 = vpop.f32.mrf.mxu0 }
  0xa7   : > { %v727_v54 = vmin.f32 %v695_v46, 0.0  ;;  %v681_v55 = vadd.f32 %v649_v37, %v417_v51  ;;  %v482_v56 = vpop.f32.mrf.mxu1 }
  0xa8   : > { %v728_v57 = vmin.f32 %v696_v50, 0.0  ;;  %v682_v58 = vadd.f32 %v650_v41, %v482_v56 }
  0xa9   : > { %v775_v62 = vmul.f32 1.442695, %v727_v54  ;;  %v713_v63 = vmin.f32 %v681_v55, 0.0 }
  0xaa   : > { %v610_v0 = vpop.permute.xlu0 %609  ;;  %v777_v3 = vmul.f32 1.442695, %v728_v57  ;;  %v714_v4 = vmin.f32 %v682_v58, 0.0  ;;  %v615_v7 = vpop.permute.xlu1 %614 }
  0xab   : > { %v665_v5 = vadd.f32 %v1725_v15, %v610_v0  ;;  %v666_v6 = vadd.f32 %v1727_v20, %v610_v0  ;;  %v1348_v8 = vpop.eup %1347  ;;  %1351 = vpow2.f32 %v775_v62  ;;  %v747_v9 = vmul.f32 1.442695, %v713_v63 }
  0xac   : > { %v1350_v13 = vpop.eup %1349  ;;  %v807_v14 = vmul.f32 %v1348_v8, %v1348_v8  ;;  %1353 = vpow2.f32 %v777_v3  ;;  %v749_v16 = vmul.f32 1.442695, %v714_v4  ;;  %v441_v17 = vpop.f32.mrf.mxu2  ;;  %v1782_v18 = vadd.f32 %v1725_v15, %v615_v7 }
  0xad   : > { %v808_v19 = vmul.f32 %v1350_v13, %v1350_v13  ;;  %1355 = vpow2.f32 %v747_v9  ;;  %v697_v21 = vadd.f32 %v665_v5, %v441_v17  ;;  %v506_v22 = vpop.f32.mrf.mxu3  ;;  %v1786_v23 = vadd.f32 %v1727_v20, %v615_v7 }
  0xae   : > { %v839_v24 = vadd.f32 %v1348_v8, %v807_v14  ;;  %v871_v25 = vmul.f32 %v807_v14, %v807_v14  ;;  %1357 = vpow2.f32 %v749_v16  ;;  %v698_v26 = vadd.f32 %v666_v6, %v506_v22  ;;  %v420_v27 = vpop.f32.mrf.mxu0 }
  0xaf   : > { %v840_v28 = vadd.f32 %v1350_v13, %v808_v19  ;;  %v872_v29 = vmul.f32 %v808_v19, %v808_v19  ;;  %v729_v30 = vmin.f32 %v697_v21, 0.0  ;;  %v1788_v31 = vadd.f32 %v651_v44, %v420_v27  ;;  %v485_v10 = vpop.f32.mrf.mxu1 }
  0xb0   : > { %v903_v32 = vadd.f32 %v871_v25, %v839_v24  ;;  %v935_v33 = vmul.f32 %v871_v25, %v871_v25  ;;  %v730_v34 = vmin.f32 %v698_v26, 0.0  ;;  %v1792_v37 = vadd.f32 %v652_v45, %v485_v10 }
  0xb1   : > { %v1352_v38 = vpop.eup %1351  ;;  %v904_v41 = vadd.f32 %v872_v29, %v840_v28  ;;  %v936_v42 = vmul.f32 %v872_v29, %v872_v29  ;;  %v779_v43 = vmul.f32 1.442695, %v729_v30  ;;  %v715_v46 = vmin.f32 %v1788_v31, 0.0 }
  0xb2   : > { %v1354_v47 = vpop.eup %1353  ;;  %v967_v50 = vadd.f32 %v935_v33, %v903_v32  ;;  %v999_v51 = vmul.f32 %v935_v33, %v935_v33  ;;  %v823_v54 = vmul.f32 %v1352_v38, %v1352_v38  ;;  %v781_v44 = vmul.f32 1.442695, %v730_v34  ;;  %v625_v14 = vpop.permute.xlu0 %624 }
  0xb3   : > { %v1356_v55 = vpop.eup %1355  ;;  %v968_v56 = vadd.f32 %v936_v42, %v904_v41  ;;  %v1000_v57 = vmul.f32 %v936_v42, %v936_v42  ;;  %v824_v58 = vmul.f32 %v1354_v47, %v1354_v47  ;;  %1359 = vpow2.f32 %v779_v43 }
  0xb4   : > { %v1358_v61 = vpop.eup %1357  ;;  %v1031_v62 = vadd.f32 %v999_v51, %v967_v50  ;;  %v855_v45 = vadd.f32 %v1352_v38, %v823_v54  ;;  %v887_v63 = vmul.f32 %v823_v54, %v823_v54  ;;  %v809_v0 = vmul.f32 %v1356_v55, %v1356_v55  ;;  %v444_v22 = vpop.f32.mrf.mxu2 }
  0xb5   : > { %v1032_v3 = vadd.f32 %v1000_v57, %v968_v56  ;;  %v856_v4 = vadd.f32 %v1354_v47, %v824_v58  ;;  %v888_v5 = vmul.f32 %v824_v58, %v824_v58  ;;  %v810_v6 = vmul.f32 %v1358_v61, %v1358_v61  ;;  %v509_v28 = vpop.f32.mrf.mxu3 }
  0xb6   : > { %1063 = vst [vmem:[%s1795_s28] sm:$0xff] %v1031_v62  ;;  %v919_v7 = vadd.f32 %v887_v63, %v855_v45  ;;  %v951_v8 = vmul.f32 %v887_v63, %v887_v63  ;;  %v841_v9 = vadd.f32 %v1356_v55, %v809_v0  ;;  %v873_v13 = vmul.f32 %v809_v0, %v809_v0  ;;  %v423_v33 = vpop.f32.mrf.mxu0  ;;  %v630_v45 = vpop.permute.xlu1 %629 }
  0xb7   : > { %1064 = vst [vmem:[%s1795_s28 + $0x8] sm:$0xff] %v1032_v3  ;;  %v920_v16 = vadd.f32 %v888_v5, %v856_v4  ;;  %v952_v17 = vmul.f32 %v888_v5, %v888_v5  ;;  %v842_v19 = vadd.f32 %v1358_v61, %v810_v6  ;;  %v874_v21 = vmul.f32 %v810_v6, %v810_v6  ;;  %v488_v3 = vpop.f32.mrf.mxu1 }
  0xb8   : > { %v983_v24 = vadd.f32 %v951_v8, %v919_v7  ;;  %v1015_v25 = vmul.f32 %v951_v8, %v951_v8  ;;  %v905_v26 = vadd.f32 %v873_v13, %v841_v9  ;;  %v937_v27 = vmul.f32 %v873_v13, %v873_v13 }
  0xb9   : > { %v1360_v29 = vpop.eup %1359  ;;  %v984_v30 = vadd.f32 %v952_v17, %v920_v16  ;;  %v1016_v31 = vmul.f32 %v952_v17, %v952_v17  ;;  %v906_v10 = vadd.f32 %v874_v21, %v842_v19  ;;  %v938_v32 = vmul.f32 %v874_v21, %v874_v21 }
  0xba   : > { %v1047_v34 = vadd.f32 %v1015_v25, %v983_v24  ;;  %v969_v38 = vadd.f32 %v937_v27, %v905_v26  ;;  %v1001_v41 = vmul.f32 %v937_v27, %v937_v27  ;;  %v825_v42 = vmul.f32 %v1360_v29, %v1360_v29  ;;  %v640_v13 = vpop.permute.xlu0 %639 }
  0xbb   : > { %v1048_v43 = vadd.f32 %v1016_v31, %v984_v30  ;;  %v970_v47 = vadd.f32 %v938_v32, %v906_v10  ;;  %v1002_v50 = vmul.f32 %v938_v32, %v938_v32  ;;  %1361 = vpow2.f32 %v781_v44 }
  0xbc   : > { %1079 = vst [vmem:[%s1795_s28 + $0x80] sm:$0xff] %v1047_v34  ;;  %v1033_v51 = vadd.f32 %v1001_v41, %v969_v38  ;;  %v857_v54 = vadd.f32 %v1360_v29, %v825_v42  ;;  %v889_v55 = vmul.f32 %v825_v42, %v825_v42  ;;  %v751_v56 = vmul.f32 1.442695, %v715_v46  ;;  %v447_v19 = vpop.f32.mrf.mxu2 }
  0xbd   : > { %1080 = vst [vmem:[%s1795_s28 + $0x88] sm:$0xff] %v1048_v43  ;;  %v1034_v57 = vadd.f32 %v1002_v50, %v970_v47  ;;  %v716_v58 = vmin.f32 %v1792_v37, 0.0  ;;  %v1803_v61 = vadd.f32 %v1725_v15, %v625_v14  ;;  %v1806_v62 = vadd.f32 %v1727_v20, %v625_v14 }
  0xbe   : > { %1065 = vst [vmem:[%s1795_s28 + $0x10] sm:$0xff] %v1033_v51  ;;  %v921_v63 = vadd.f32 %v889_v55, %v857_v54  ;;  %v953_v44 = vmul.f32 %v889_v55, %v889_v55  ;;  %1363 = vpow2.f32 %v751_v56  ;;  %v699_v0 = vadd.f32 %v1782_v18, %v444_v22 }
  0xbf   : > { %1066 = vst [vmem:[%s1795_s28 + $0x18] sm:$0xff] %v1034_v57  ;;  %v753_v46 = vmul.f32 1.442695, %v716_v58  ;;  %v700_v4 = vadd.f32 %v1786_v23, %v509_v28  ;;  %v685_v37 = vadd.f32 %v1750_v48, %v423_v33  ;;  %v686_v5 = vadd.f32 %v1753_v49, %v488_v3  ;;  %v512_v49 = vpop.f32.mrf.mxu3  ;;  %v426_v28 = vpop.f32.mrf.mxu0 }
  0xc0   : > { %v985_v6 = vadd.f32 %v953_v44, %v921_v63  ;;  %v1017_v7 = vmul.f32 %v953_v44, %v953_v44  ;;  %v731_v8 = vmin.f32 %v699_v0, 0.0  ;;  %v1815_v9 = vadd.f32 %v1725_v15, %v630_v45  ;;  %v1833_v0 = vpop.f32.mrf.mxu1 }
  0xc1   : > { %v1362_v14 = vpop.eup %1361  ;;  %1365 = vpow2.f32 %v753_v46  ;;  %v732_v18 = vmin.f32 %v700_v4, 0.0  ;;  %v717_v16 = vmin.f32 %v685_v37, 0.0  ;;  %v718_v17 = vmin.f32 %v686_v5, 0.0 }
  0xc2   : > { %v1049_v21 = vadd.f32 %v1017_v7, %v985_v6  ;;  %v826_v23 = vmul.f32 %v1362_v14, %v1362_v14  ;;  %v783_v22 = vmul.f32 1.442695, %v731_v8  ;;  %v1818_v48 = vadd.f32 %v1727_v20, %v630_v45 }
  0xc3   : > { %v785_v24 = vmul.f32 1.442695, %v732_v18  ;;  %v755_v25 = vmul.f32 1.442695, %v717_v16  ;;  %v757_v26 = vmul.f32 1.442695, %v718_v17  ;;  %v1821_v27 = vadd.f32 %v1725_v15, %v640_v13 }
  0xc4   : > { %v1364_v29 = vpop.eup %1363  ;;  %1081 = vst [vmem:[%s1795_s28 + $0x90] sm:$0xff] %v1049_v21  ;;  %v858_v30 = vadd.f32 %v1362_v14, %v826_v23  ;;  %v890_v31 = vmul.f32 %v826_v23, %v826_v23  ;;  %1367 = vpow2.f32 %v783_v22  ;;  %v1825_v10 = vadd.f32 %v1727_v20, %v640_v13  ;;  %v1835_v5 = vpop.f32.mrf.mxu2 }
  0xc5   : > { %v811_v32 = vmul.f32 %v1364_v29, %v1364_v29  ;;  %1369 = vpow2.f32 %v785_v24  ;;  %v701_v33 = vadd.f32 %v1768_v1, %v447_v19  ;;  %v702_v34 = vadd.f32 %v1771_v2, %v512_v49 }
  0xc6   : > { %v922_v38 = vadd.f32 %v890_v31, %v858_v30  ;;  %v954_v41 = vmul.f32 %v890_v31, %v890_v31  ;;  %1371 = vpow2.f32 %v755_v25  ;;  %v1830_v15 = vadd.f32 %v1734_v35, %v426_v28 }
  0xc7   : > { %v1366_v42 = vpop.eup %1365  ;;  %v843_v43 = vadd.f32 %v1364_v29, %v811_v32  ;;  %v875_v47 = vmul.f32 %v811_v32, %v811_v32  ;;  %1373 = vpow2.f32 %v757_v26  ;;  %v733_v50 = vmin.f32 %v701_v33, 0.0  ;;  %v1838_v14 = vpop.f32.mrf.mxu3 }
  0xc8   : > { %v986_v51 = vadd.f32 %v954_v41, %v922_v38  ;;  %v1018_v20 = vmul.f32 %v954_v41, %v954_v41  ;;  %v812_v54 = vmul.f32 %v1366_v42, %v1366_v42  ;;  %v734_v55 = vmin.f32 %v702_v34, 0.0 }
  0xc9   : > { %v907_v56 = vadd.f32 %v875_v47, %v843_v43  ;;  %v939_v57 = vmul.f32 %v875_v47, %v875_v47  ;;  %v787_v1 = vmul.f32 1.442695, %v733_v50  ;;  %v719_v2 = vmin.f32 %v1830_v15, 0.0 }
  0xca   : > { %v1368_v58 = vpop.eup %1367  ;;  %v1050_v45 = vadd.f32 %v1018_v20, %v986_v51  ;;  %v844_v63 = vadd.f32 %v1366_v42, %v812_v54  ;;  %v876_v35 = vmul.f32 %v812_v54, %v812_v54  ;;  %v789_v44 = vmul.f32 1.442695, %v734_v55  ;;  %v429_v55 = vpop.f32.mrf.mxu0 }
  0xcb   : > { %v1370_v3 = vpop.eup %1369  ;;  %v971_v46 = vadd.f32 %v939_v57, %v907_v56  ;;  %v1003_v4 = vmul.f32 %v939_v57, %v939_v57  ;;  %v827_v37 = vmul.f32 %v1368_v58, %v1368_v58  ;;  %1375 = vpow2.f32 %v787_v1 }
  0xcc   : > { %v1372_v6 = vpop.eup %1371  ;;  %1082 = vst [vmem:[%s1795_s28 + $0x98] sm:$0xff] %v1050_v45  ;;  %v908_v7 = vadd.f32 %v876_v35, %v844_v63  ;;  %v940_v8 = vmul.f32 %v876_v35, %v876_v35  ;;  %v828_v13 = vmul.f32 %v1370_v3, %v1370_v3  ;;  %1377 = vpow2.f32 %v789_v44 }
  0xcd   : > { %v1374_v18 = vpop.eup %1373  ;;  %v1035_v16 = vadd.f32 %v1003_v4, %v971_v46  ;;  %v859_v17 = vadd.f32 %v1368_v58, %v827_v37  ;;  %v891_v19 = vmul.f32 %v827_v37, %v827_v37  ;;  %v813_v21 = vmul.f32 %v1372_v6, %v1372_v6 }
  0xce   : > { %v972_v23 = vadd.f32 %v940_v8, %v908_v7  ;;  %v1004_v22 = vmul.f32 %v940_v8, %v940_v8  ;;  %v860_v49 = vadd.f32 %v1370_v3, %v828_v13  ;;  %v892_v24 = vmul.f32 %v828_v13, %v828_v13  ;;  %v494_v3 = vpop.f32.mrf.mxu1  ;;  %v453_v7 = vpop.f32.mrf.mxu2 }
  0xcf   : > { %1067 = vst [vmem:[%s1795_s28 + $0x20] sm:$0xff] %v1035_v16  ;;  %v923_v25 = vadd.f32 %v891_v19, %v859_v17  ;;  %v955_v26 = vmul.f32 %v891_v19, %v891_v19  ;;  %v845_v28 = vadd.f32 %v1372_v6, %v813_v21  ;;  %v877_v29 = vmul.f32 %v813_v21, %v813_v21  ;;  %v518_v17 = vpop.f32.mrf.mxu3 }
  0xd0   : > { %v1036_v30 = vadd.f32 %v1004_v22, %v972_v23  ;;  %v924_v31 = vadd.f32 %v892_v24, %v860_v49  ;;  %v956_v32 = vmul.f32 %v892_v24, %v892_v24  ;;  %v814_v33 = vmul.f32 %v1374_v18, %v1374_v18 }
  0xd1   : > { %v1376_v34 = vpop.eup %1375  ;;  %v987_v38 = vadd.f32 %v955_v26, %v923_v25  ;;  %v1019_v41 = vmul.f32 %v955_v26, %v955_v26  ;;  %v909_v42 = vadd.f32 %v877_v29, %v845_v28  ;;  %v941_v43 = vmul.f32 %v877_v29, %v877_v29 }
  0xd2   : > { %v1378_v47 = vpop.eup %1377  ;;  %1068 = vst [vmem:[%s1795_s28 + $0x28] sm:$0xff] %v1036_v30  ;;  %v988_v50 = vadd.f32 %v956_v32, %v924_v31  ;;  %v1020_v51 = vmul.f32 %v956_v32, %v956_v32  ;;  %v846_v20 = vadd.f32 %v1374_v18, %v814_v33  ;;  %v878_v54 = vmul.f32 %v814_v33, %v814_v33 }
  0xd3   : > { %v1051_v56 = vadd.f32 %v1019_v41, %v987_v38  ;;  %v973_v57 = vadd.f32 %v941_v43, %v909_v42  ;;  %v1005_v1 = vmul.f32 %v941_v43, %v941_v43  ;;  %v829_v58 = vmul.f32 %v1376_v34, %v1376_v34  ;;  %v432_v42 = vpop.f32.mrf.mxu0 }
  0xd4   : > { %v1052_v45 = vadd.f32 %v1020_v51, %v988_v50  ;;  %v910_v63 = vadd.f32 %v878_v54, %v846_v20  ;;  %v942_v35 = vmul.f32 %v878_v54, %v878_v54  ;;  %v830_v44 = vmul.f32 %v1378_v47, %v1378_v47 }
  0xd5   : > { %1083 = vst [vmem:[%s1795_s28 + $0xa0] sm:$0xff] %v1051_v56  ;;  %v1037_v46 = vadd.f32 %v1005_v1, %v973_v57  ;;  %v861_v4 = vadd.f32 %v1376_v34, %v829_v58  ;;  %v893_v37 = vmul.f32 %v829_v58, %v829_v58  ;;  %v759_v6 = vmul.f32 1.442695, %v719_v2 }
  0xd6   : > { %1084 = vst [vmem:[%s1795_s28 + $0xa8] sm:$0xff] %v1052_v45  ;;  %v974_v8 = vadd.f32 %v942_v35, %v910_v63  ;;  %v1006_v13 = vmul.f32 %v942_v35, %v942_v35  ;;  %v862_v18 = vadd.f32 %v1378_v47, %v830_v44  ;;  %v894_v16 = vmul.f32 %v830_v44, %v830_v44  ;;  %v497_v20 = vpop.f32.mrf.mxu1 }
  0xd7   : > { %1069 = vst [vmem:[%s1795_s28 + $0x30] sm:$0xff] %v1037_v46  ;;  %v925_v19 = vadd.f32 %v893_v37, %v861_v4  ;;  %v957_v21 = vmul.f32 %v893_v37, %v893_v37  ;;  %1379 = vpow2.f32 %v759_v6  ;;  %v688_v23 = vadd.f32 %v1737_v36, %v1833_v0  ;;  %v521_v58 = vpop.f32.mrf.mxu3 }
  0xd8   : > { %v1038_v22 = vadd.f32 %v1006_v13, %v974_v8  ;;  %v926_v49 = vadd.f32 %v894_v16, %v862_v18  ;;  %v958_v24 = vmul.f32 %v894_v16, %v894_v16  ;;  %v703_v15 = vadd.f32 %v1803_v61, %v1835_v5 }
  0xd9   : > { %v989_v2 = vadd.f32 %v957_v21, %v925_v19  ;;  %v1021_v25 = vmul.f32 %v957_v21, %v957_v21  ;;  %v720_v26 = vmin.f32 %v688_v23, 0.0  ;;  %v704_v28 = vadd.f32 %v1806_v62, %v1838_v14 }
  0xda   : > { %1070 = vst [vmem:[%s1795_s28 + $0x38] sm:$0xff] %v1038_v22  ;;  %v990_v29 = vadd.f32 %v958_v24, %v926_v49  ;;  %v1022_v30 = vmul.f32 %v958_v24, %v958_v24  ;;  %v735_v31 = vmin.f32 %v703_v15, 0.0  ;;  %v689_v32 = vadd.f32 %v1741_v39, %v429_v55 }
  0xdb   : > { %v1053_v36 = vadd.f32 %v1021_v25, %v989_v2  ;;  %v761_v0 = vmul.f32 1.442695, %v720_v26  ;;  %v736_v33 = vmin.f32 %v704_v28, 0.0  ;;  %v690_v34 = vadd.f32 %v1744_v40, %v494_v3 }
  0xdc   : > { %v1054_v61 = vadd.f32 %v1022_v30, %v990_v29  ;;  %v791_v5 = vmul.f32 1.442695, %v735_v31  ;;  %v721_v38 = vmin.f32 %v689_v32, 0.0  ;;  %v705_v41 = vadd.f32 %v1815_v9, %v453_v7  ;;  %v456_v9 = vpop.f32.mrf.mxu2 }
  0xdd   : > { %v1380_v62 = vpop.eup %1379  ;;  %1085 = vst [vmem:[%s1795_s28 + $0xb0] sm:$0xff] %v1053_v36  ;;  %1381 = vpow2.f32 %v761_v0  ;;  %v793_v14 = vmul.f32 1.442695, %v736_v33  ;;  %v722_v43 = vmin.f32 %v690_v34, 0.0  ;;  %v706_v47 = vadd.f32 %v1818_v48, %v518_v17 }
  0xde   : > { %1086 = vst [vmem:[%s1795_s28 + $0xb8] sm:$0xff] %v1054_v61  ;;  %v815_v39 = vmul.f32 %v1380_v62, %v1380_v62  ;;  %1383 = vpow2.f32 %v791_v5  ;;  %v763_v50 = vmul.f32 1.442695, %v721_v38  ;;  %v737_v51 = vmin.f32 %v705_v41, 0.0 }
  0xdf   : > { %1385 = vpow2.f32 %v793_v14  ;;  %v765_v40 = vmul.f32 1.442695, %v722_v43  ;;  %v738_v54 = vmin.f32 %v706_v47, 0.0  ;;  %v691_v55 = vadd.f32 %v1756_v52, %v432_v42 }
  0xe0   : > { %v847_v56 = vadd.f32 %v1380_v62, %v815_v39  ;;  %v879_v57 = vmul.f32 %v815_v39, %v815_v39  ;;  %1387 = vpow2.f32 %v763_v50  ;;  %v795_v1 = vmul.f32 1.442695, %v737_v51 }
  0xe1   : > { %1389 = vpow2.f32 %v765_v40  ;;  %v797_v45 = vmul.f32 1.442695, %v738_v54  ;;  %v723_v48 = vmin.f32 %v691_v55, 0.0  ;;  %v692_v63 = vadd.f32 %v1759_v53, %v497_v20 }
  0xe2   : > { %v911_v35 = vadd.f32 %v879_v57, %v847_v56  ;;  %v943_v44 = vmul.f32 %v879_v57, %v879_v57  ;;  %1391 = vpow2.f32 %v795_v1  ;;  %v1863_v3 = vadd.f32 %v1776_v11, %v456_v9 }
  0xe3   : > { %v1382_v46 = vpop.eup %1381  ;;  %1393 = vpow2.f32 %v797_v45  ;;  %v767_v52 = vmul.f32 1.442695, %v723_v48  ;;  %v724_v4 = vmin.f32 %v692_v63, 0.0  ;;  %v1866_v37 = vadd.f32 %v1779_v12, %v521_v58 }
  0xe4   : > { %v1384_v6 = vpop.eup %1383  ;;  %v975_v7 = vadd.f32 %v943_v44, %v911_v35  ;;  %v1007_v8 = vmul.f32 %v943_v44, %v943_v44  ;;  %v816_v13 = vmul.f32 %v1382_v46, %v1382_v46  ;;  %v739_v18 = vmin.f32 %v1863_v3, 0.0 }
  0xe5   : > { %v1386_v53 = vpop.eup %1385  ;;  %v831_v16 = vmul.f32 %v1384_v6, %v1384_v6  ;;  %1395 = vpow2.f32 %v767_v52  ;;  %v769_v17 = vmul.f32 1.442695, %v724_v4  ;;  %v740_v11 = vmin.f32 %v1866_v37, 0.0 }
  0xe6   : > { %v1388_v19 = vpop.eup %1387  ;;  %v1039_v21 = vadd.f32 %v1007_v8, %v975_v7  ;;  %v848_v23 = vadd.f32 %v1382_v46, %v816_v13  ;;  %v880_v22 = vmul.f32 %v816_v13, %v816_v13  ;;  %v832_v49 = vmul.f32 %v1386_v53, %v1386_v53 }
  0xe7   : > { %v1390_v12 = vpop.eup %1389  ;;  %v863_v24 = vadd.f32 %v1384_v6, %v831_v16  ;;  %v895_v15 = vmul.f32 %v831_v16, %v831_v16  ;;  %v817_v2 = vmul.f32 %v1388_v19, %v1388_v19  ;;  %1397 = vpow2.f32 %v769_v17 }
  0xe8   : > { %v1392_v25 = vpop.eup %1391  ;;  %1071 = vst [vmem:[%s1795_s28 + $0x40] sm:$0xff] %v1039_v21  ;;  %v912_v26 = vadd.f32 %v880_v22, %v848_v23  ;;  %v944_v28 = vmul.f32 %v880_v22, %v880_v22  ;;  %v864_v29 = vadd.f32 %v1386_v53, %v832_v49  ;;  %v896_v30 = vmul.f32 %v832_v49, %v832_v49 }
  0xe9   : > { %v1394_v31 = vpop.eup %1393  ;;  %v927_v32 = vadd.f32 %v895_v15, %v863_v24  ;;  %v959_v36 = vmul.f32 %v895_v15, %v895_v15  ;;  %v849_v0 = vadd.f32 %v1388_v19, %v817_v2  ;;  %v881_v33 = vmul.f32 %v817_v2, %v817_v2 }
  0xea   : > { %v976_v34 = vadd.f32 %v944_v28, %v912_v26  ;;  %v1008_v61 = vmul.f32 %v944_v28, %v944_v28  ;;  %v928_v5 = vadd.f32 %v896_v30, %v864_v29  ;;  %v960_v38 = vmul.f32 %v896_v30, %v896_v30  ;;  %v500_v26 = vpop.f32.mrf.mxu1 }
  0xeb   : > { %v1396_v41 = vpop.eup %1395  ;;  %v991_v42 = vadd.f32 %v959_v36, %v927_v32  ;;  %v1023_v62 = vmul.f32 %v959_v36, %v959_v36  ;;  %v913_v14 = vadd.f32 %v881_v33, %v849_v0  ;;  %v945_v43 = vmul.f32 %v881_v33, %v881_v33  ;;  %v459_v32 = vpop.f32.mrf.mxu2 }
  0xec   : > { %v1040_v47 = vadd.f32 %v1008_v61, %v976_v34  ;;  %v992_v39 = vadd.f32 %v960_v38, %v928_v5  ;;  %v1024_v50 = vmul.f32 %v960_v38, %v960_v38  ;;  %v818_v51 = vmul.f32 %v1390_v12, %v1390_v12  ;;  %v524_v61 = vpop.f32.mrf.mxu3 }
  0xed   : > { %v1398_v20 = vpop.eup %1397  ;;  %v1055_v40 = vadd.f32 %v1023_v62, %v991_v42  ;;  %v977_v54 = vadd.f32 %v945_v43, %v913_v14  ;;  %v1009_v55 = vmul.f32 %v945_v43, %v945_v43  ;;  %v833_v9 = vmul.f32 %v1392_v25, %v1392_v25 }
  0xee   : > { %1072 = vst [vmem:[%s1795_s28 + $0x48] sm:$0xff] %v1040_v47  ;;  %v1056_v56 = vadd.f32 %v1024_v50, %v992_v39  ;;  %v850_v57 = vadd.f32 %v1390_v12, %v818_v51  ;;  %v882_v1 = vmul.f32 %v818_v51, %v818_v51  ;;  %v834_v58 = vmul.f32 %v1394_v31, %v1394_v31 }
  0xef   : > { %1087 = vst [vmem:[%s1795_s28 + $0xc0] sm:$0xff] %v1055_v40  ;;  %v1041_v45 = vadd.f32 %v1009_v55, %v977_v54  ;;  %v865_v48 = vadd.f32 %v1392_v25, %v833_v9  ;;  %v897_v63 = vmul.f32 %v833_v9, %v833_v9  ;;  %v819_v35 = vmul.f32 %v1396_v41, %v1396_v41  ;;  %v435_v25 = vpop.f32.mrf.mxu0 }
  0xf0   : > { %1088 = vst [vmem:[%s1795_s28 + $0xc8] sm:$0xff] %v1056_v56  ;;  %v914_v44 = vadd.f32 %v882_v1, %v850_v57  ;;  %v946_v46 = vmul.f32 %v882_v1, %v882_v1  ;;  %v866_v52 = vadd.f32 %v1394_v31, %v834_v58  ;;  %v898_v4 = vmul.f32 %v834_v58, %v834_v58 }
  0xf1   : > { %1073 = vst [vmem:[%s1795_s28 + $0x50] sm:$0xff] %v1041_v45  ;;  %v929_v6 = vadd.f32 %v897_v63, %v865_v48  ;;  %v961_v7 = vmul.f32 %v897_v63, %v897_v63  ;;  %v851_v8 = vadd.f32 %v1396_v41, %v819_v35  ;;  %v883_v13 = vmul.f32 %v819_v35, %v819_v35 }
  0xf2   : > { %v978_v53 = vadd.f32 %v946_v46, %v914_v44  ;;  %v1010_v16 = vmul.f32 %v946_v46, %v946_v46  ;;  %v930_v17 = vadd.f32 %v898_v4, %v866_v52  ;;  %v962_v19 = vmul.f32 %v898_v4, %v898_v4 }
  0xf3   : > { %v993_v21 = vadd.f32 %v961_v7, %v929_v6  ;;  %v1025_v23 = vmul.f32 %v961_v7, %v961_v7  ;;  %v915_v22 = vadd.f32 %v883_v13, %v851_v8  ;;  %v947_v49 = vmul.f32 %v883_v13, %v883_v13 }
  0xf4   : > { %v1042_v12 = vadd.f32 %v1010_v16, %v978_v53  ;;  %v994_v24 = vadd.f32 %v962_v19, %v930_v17  ;;  %v1026_v15 = vmul.f32 %v962_v19, %v962_v19  ;;  %v820_v2 = vmul.f32 %v1398_v20, %v1398_v20 }
  0xf5   : > { %v1057_v28 = vadd.f32 %v1025_v23, %v993_v21  ;;  %v979_v29 = vadd.f32 %v947_v49, %v915_v22  ;;  %v1011_v30 = vmul.f32 %v947_v49, %v947_v49  ;;  %v799_v31 = vmul.f32 1.442695, %v739_v18 }
  0xf6   : > { %1074 = vst [vmem:[%s1795_s28 + $0x58] sm:$0xff] %v1042_v12  ;;  %v1058_v36 = vadd.f32 %v1026_v15, %v994_v24  ;;  %v852_v0 = vadd.f32 %v1398_v20, %v820_v2  ;;  %v884_v33 = vmul.f32 %v820_v2, %v820_v2  ;;  %v801_v34 = vmul.f32 1.442695, %v740_v11 }
  0xf7   : > { %1089 = vst [vmem:[%s1795_s28 + $0xd0] sm:$0xff] %v1057_v28  ;;  %v1043_v5 = vadd.f32 %v1011_v30, %v979_v29  ;;  %1399 = vpow2.f32 %v799_v31  ;;  %v693_v38 = vadd.f32 %v1762_v59, %v435_v25  ;;  %v694_v41 = vadd.f32 %v1765_v60, %v500_v26 }
  0xf8   : > { %1090 = vst [vmem:[%s1795_s28 + $0xd8] sm:$0xff] %v1058_v36  ;;  %v916_v3 = vadd.f32 %v884_v33, %v852_v0  ;;  %v948_v18 = vmul.f32 %v884_v33, %v884_v33  ;;  %1401 = vpow2.f32 %v801_v34  ;;  %v709_v42 = vadd.f32 %v1821_v27, %v459_v32 }
  0xf9   : > { %1075 = vst [vmem:[%s1795_s28 + $0x60] sm:$0xff] %v1043_v5  ;;  %v725_v62 = vmin.f32 %v693_v38, 0.0  ;;  %v726_v14 = vmin.f32 %v694_v41, 0.0  ;;  %v710_v37 = vadd.f32 %v1825_v10, %v524_v61 }
  0xfa   : > { %v980_v11 = vadd.f32 %v948_v18, %v916_v3  ;;  %v1012_v43 = vmul.f32 %v948_v18, %v948_v18  ;;  %v741_v47 = vmin.f32 %v709_v42, 0.0 }
  0xfb   : > { %v771_v39 = vmul.f32 1.442695, %v725_v62  ;;  %v773_v50 = vmul.f32 1.442695, %v726_v14  ;;  %v742_v59 = vmin.f32 %v710_v37, 0.0 }
  0xfc   : > { %v1044_v51 = vadd.f32 %v1012_v43, %v980_v11  ;;  %v803_v60 = vmul.f32 1.442695, %v741_v47 }
  0xfd   : > { %v1400_v20 = vpop.eup %1399  ;;  %1403 = vpow2.f32 %v771_v39  ;;  %v805_v40 = vmul.f32 1.442695, %v742_v59 }
  0xfe   : > { %v1402_v54 = vpop.eup %1401  ;;  %1076 = vst [vmem:[%s1795_s28 + $0x68] sm:$0xff] %v1044_v51  ;;  %v835_v27 = vmul.f32 %v1400_v20, %v1400_v20  ;;  %1405 = vpow2.f32 %v773_v50 }
  0xff   : > { %v836_v55 = vmul.f32 %v1402_v54, %v1402_v54  ;;  %1407 = vpow2.f32 %v803_v60 }
 0x100   : > { %v867_v9 = vadd.f32 %v1400_v20, %v835_v27  ;;  %v899_v56 = vmul.f32 %v835_v27, %v835_v27  ;;  %1409 = vpow2.f32 %v805_v40 }
 0x101   : > { %v868_v10 = vadd.f32 %v1402_v54, %v836_v55  ;;  %v900_v57 = vmul.f32 %v836_v55, %v836_v55 }
 0x102   : > { %v931_v1 = vadd.f32 %v899_v56, %v867_v9  ;;  %v963_v58 = vmul.f32 %v899_v56, %v899_v56 }
 0x103   : > { %v1404_v45 = vpop.eup %1403  ;;  %v932_v48 = vadd.f32 %v900_v57, %v868_v10  ;;  %v964_v63 = vmul.f32 %v900_v57, %v900_v57 }
 0x104   : > { %v1406_v35 = vpop.eup %1405  ;;  %v995_v44 = vadd.f32 %v963_v58, %v931_v1  ;;  %v1027_v46 = vmul.f32 %v963_v58, %v963_v58  ;;  %v821_v52 = vmul.f32 %v1404_v45, %v1404_v45 }
 0x105   : > { %v1408_v4 = vpop.eup %1407  ;;  %v996_v6 = vadd.f32 %v964_v63, %v932_v48  ;;  %v1028_v7 = vmul.f32 %v964_v63, %v964_v63  ;;  %v822_v8 = vmul.f32 %v1406_v35, %v1406_v35 }
 0x106   : > { %v1410_v13 = vpop.eup %1409  ;;  %v1059_v53 = vadd.f32 %v1027_v46, %v995_v44  ;;  %v853_v16 = vadd.f32 %v1404_v45, %v821_v52  ;;  %v885_v17 = vmul.f32 %v821_v52, %v821_v52  ;;  %v837_v19 = vmul.f32 %v1408_v4, %v1408_v4 }
 0x107   : > { %v1060_v21 = vadd.f32 %v1028_v7, %v996_v6  ;;  %v854_v23 = vadd.f32 %v1406_v35, %v822_v8  ;;  %v886_v22 = vmul.f32 %v822_v8, %v822_v8  ;;  %v838_v49 = vmul.f32 %v1410_v13, %v1410_v13 }
 0x108   : > { %1091 = vst [vmem:[%s1795_s28 + $0xe0] sm:$0xff] %v1059_v53  ;;  %v917_v12 = vadd.f32 %v885_v17, %v853_v16  ;;  %v949_v24 = vmul.f32 %v885_v17, %v885_v17  ;;  %v869_v15 = vadd.f32 %v1408_v4, %v837_v19  ;;  %v901_v2 = vmul.f32 %v837_v19, %v837_v19 }
 0x109   : > { %1092 = vst [vmem:[%s1795_s28 + $0xe8] sm:$0xff] %v1060_v21  ;;  %v918_v25 = vadd.f32 %v886_v22, %v854_v23  ;;  %v950_v26 = vmul.f32 %v886_v22, %v886_v22  ;;  %v870_v28 = vadd.f32 %v1410_v13, %v838_v49  ;;  %v902_v29 = vmul.f32 %v838_v49, %v838_v49 }
 0x10a   : > { %v981_v30 = vadd.f32 %v949_v24, %v917_v12  ;;  %v1013_v31 = vmul.f32 %v949_v24, %v949_v24  ;;  %v933_v32 = vadd.f32 %v901_v2, %v869_v15  ;;  %v965_v36 = vmul.f32 %v901_v2, %v901_v2 }
 0x10b   : > { %v982_v0 = vadd.f32 %v950_v26, %v918_v25  ;;  %v1014_v33 = vmul.f32 %v950_v26, %v950_v26  ;;  %v934_v34 = vadd.f32 %v902_v29, %v870_v28  ;;  %v966_v61 = vmul.f32 %v902_v29, %v902_v29 }
 0x10c   : > { %v1045_v5 = vadd.f32 %v1013_v31, %v981_v30  ;;  %v997_v38 = vadd.f32 %v965_v36, %v933_v32  ;;  %v1029_v41 = vmul.f32 %v965_v36, %v965_v36 }
 0x10d   : > { %v1046_v3 = vadd.f32 %v1014_v33, %v982_v0  ;;  %v998_v18 = vadd.f32 %v966_v61, %v934_v34  ;;  %v1030_v42 = vmul.f32 %v966_v61, %v966_v61 }
 0x10e   : > { %1077 = vst [vmem:[%s1795_s28 + $0x70] sm:$0xff] %v1045_v5  ;;  %v1061_v62 = vadd.f32 %v1029_v41, %v997_v38 }
 0x10f   : > { %1078 = vst [vmem:[%s1795_s28 + $0x78] sm:$0xff] %v1046_v3  ;;  %v1062_v14 = vadd.f32 %v1030_v42, %v998_v18 }
 0x110   : > { %1093 = vst [vmem:[%s1795_s28 + $0xf0] sm:$0xff] %v1061_v62 }
 0x111   : > { %1094 = vst [vmem:[%s1795_s28 + $0xf8] sm:$0xff] %v1062_v14 }
 0x112   : > { %1438 = shalt.err (!%p1435_p5)
}
 0x113   : > { %s1492_s4 = smov 256   ;;  %s1493_s26 = smov 16  }
 0x114   : > { %1286 = dma.vmem_to_hbm [thread:$0]  (%p1567_p4), %s1112_s10, 4096, %s1114_s11, %s1096_s12, %s1492_s4, %s1492_s4, %s1493_s26  }
 0x115 PF: > { %p1292_p6 = scmp.ge.s32.totalorder %s1489_s25, 2  ;;  %s1128_s28 = sand.u32 1, %s1469_s20  }
 0x116   : > { %s1129_s30 = scalar_lea.sflag [#allocation4], %s1128_s28 }
 0x117   : > { %p1289_p7 = pnand %p1292_p6, %p1574_p8 }
 0x119   : > { %p1290_p9 = pneg %p1289_p7 }
 0x11b   : > { %1464 = dma.done.wait (%p1290_p9), %s1129_s30, 4096  }
 0x11c   : > { %1466 = vsyncadd (%p1290_p9), %s1129_s30, 4294963200  ;;  %s19_s25 = sadd.s32 1, %s1489_s25   ;;  %s1941_s20 = smov %s1473_s21 }
 0x11d   : > { %p16_p10 = scmp.ge.s32.totalorder %s19_s25, 4   ;;  %s1942_s21 = smov %s1477_s22 }
 0x11e   : > { %s1943_s22 = smov %s1580_s7  ;;  %s1944_s23 = smov %s1485_s24 }
 0x11f   : > { %s1945_s24 = smov %s1947_s27  ;;  %18 = sbr.rel (!%p16_p10) target bundleno = 6 (0x6), region = 84 }
 0x124   :  { %1135 = vsyncpa [#allocation4], 1 }
 0x125   :  { %1137 = vsyncpa [#allocation4 + $0x1], 1 }

</bundles_post_ra>
